<compile_context>
chip_gen: v7x
topology: tpu7x:2x2x1
jax: 0.10.0
libtpu: 0.0.40
codegen_flags: <defaults>
</compile_context>

<pallas_src>
import functools

import jax
import jax.numpy as jnp
from jax.experimental import pallas as pl
from jax.experimental.pallas import tpu as pltpu

HIDDEN = 5
INPUT_FEATURES = 4
OUTPUT_CLASSES = 1


def mlp_kernel(w1_ref, b1_ref, w2_ref, b2_ref, x_ref, o_ref):
    """One (S, 128) batch tile; batch on both the sublane and lane axes.

    x_ref : (INPUT_FEATURES, S, 128) VMEM
    w1_ref: (HIDDEN*INPUT_FEATURES,) SMEM  -- fc1.weight, PyTorch (out,in) row-major
    b1_ref: (HIDDEN,)                SMEM  -- fc1.bias
    w2_ref: (HIDDEN,)                SMEM  -- fc2.weight[0, :]
    b2_ref: (OUTPUT_CLASSES,)        SMEM  -- fc2.bias
    o_ref : (OUTPUT_CLASSES, S, 128) VMEM  -- lane- and sublane-dense output
    """
    # Hoist the feature rows out of the hidden-unit loop: each is one dense
    # (S, 128) load, not a per-h relayout of a sublane slice.
    rows = [x_ref[k] for k in range(INPUT_FEATURES)]
    shape = rows[0].shape

    # fc2 fused into fc1's epilogue (OUTPUT_CLASSES == 1): accumulator starts at b2.
    acc = jnp.full(shape, b2_ref[0], dtype=jnp.float32)
    for h in range(HIDDEN):                          # fully unrolled: 20 VPU FMAs / tile
        pre = jnp.full(shape, b1_ref[h], dtype=jnp.float32)
        for k in range(INPUT_FEATURES):
            pre = pre + w1_ref[h * INPUT_FEATURES + k] * rows[k]
        # sigmoid(x) = 0.5 * tanh(0.5 * x) + 0.5  -> single EUP op, exact.
        sig = 0.5 * jnp.tanh(0.5 * pre) + 0.5
        acc = acc + w2_ref[h] * sig
    o_ref[0] = acc.astype(o_ref.dtype)


def _round_up(a, m):
    return (a + m - 1) // m * m


@functools.partial(jax.jit, static_argnames=("block_rows",))
def net_forward_features_first(x_t, w1, b1, w2, b2, *, block_rows=2048):
    """Forward pass of Net, with activations already features-first.

    x_t: (INPUT_FEATURES, B) f32   -- no host-side transpose needed
    w1 : (HIDDEN, INPUT_FEATURES), b1: (HIDDEN,)          -- fc1 (nn.Linear layout)
    w2 : (OUTPUT_CLASSES, HIDDEN), b2: (OUTPUT_CLASSES,)  -- fc2
    returns (B, OUTPUT_CLASSES) f32
    """
    assert OUTPUT_CLASSES == 1
    assert x_t.shape[0] == INPUT_FEATURES
    assert block_rows % 8 == 0 and block_rows >= 8, "block_rows must be a multiple of 8"
    B = x_t.shape[1]

    # Batch -> (sublane, lane): pad B to whole (S, 128) tiles, then a FREE
    # row-major reshape gives (INPUT_FEATURES, n128, 128).
    n128 = _round_up(pl.cdiv(B, 128), 8)       # number of 128-lane rows (>= 8)
    s_rows = min(block_rows, n128)             # sublane rows per grid step
    n128 = _round_up(n128, s_rows)             # grid divides evenly
    b_pad = n128 * 128

    x_p = jnp.pad(x_t.astype(jnp.float32), ((0, 0), (0, b_pad - B)))
    x3 = x_p.reshape(INPUT_FEATURES, n128, 128)          # free reshape

    smem = pl.BlockSpec(memory_space=pltpu.MemorySpace.SMEM)
    out = pl.pallas_call(
        mlp_kernel,
        out_shape=jax.ShapeDtypeStruct((OUTPUT_CLASSES, n128, 128), jnp.float32),
        grid=(n128 // s_rows,),
        in_specs=[
            smem,                                                    # w1 flat
            smem,                                                    # b1
            smem,                                                    # w2 row
            smem,                                                    # b2
            pl.BlockSpec((INPUT_FEATURES, s_rows, 128), lambda i: (0, i, 0)),
        ],
        out_specs=pl.BlockSpec((OUTPUT_CLASSES, s_rows, 128), lambda i: (0, i, 0)),
        compiler_params=pltpu.CompilerParams(
            dimension_semantics=("parallel",)),  # batch grid shards across v7x's 2 TCs
    )(w1.reshape(-1), b1.reshape(-1), w2.reshape(-1), b2.reshape(-1), x3)

    # Padded batch positions are sliced off here (they hold garbage by design).
    return out.reshape(-1)[:B].reshape(B, OUTPUT_CLASSES)


@functools.partial(jax.jit, static_argnames=("block_rows",))
def net_forward(x, w1, b1, w2, b2, *, block_rows=2048):
    """Convenience wrapper for the PyTorch-natural (B, INPUT_FEATURES) layout.

    NOTE: the x.T below is one extra HBM pass over x; for large batches produce
    x features-first upstream and call `net_forward_features_first` directly.
    """
    return net_forward_features_first(x.T, w1, b1, w2, b2, block_rows=block_rows)


def init_params(key):
    """Deterministic init mimicking nn.Linear's U(-1/sqrt(fan_in), 1/sqrt(fan_in)),
    stored in PyTorch parameter layout."""
    k1, k2, k3, k4 = jax.random.split(key, 4)
    bound1 = 1.0 / jnp.sqrt(INPUT_FEATURES)
    bound2 = 1.0 / jnp.sqrt(HIDDEN)
    w1 = jax.random.uniform(k1, (HIDDEN, INPUT_FEATURES), jnp.float32, -bound1, bound1)
    b1 = jax.random.uniform(k2, (HIDDEN,), jnp.float32, -bound1, bound1)
    w2 = jax.random.uniform(k3, (OUTPUT_CLASSES, HIDDEN), jnp.float32, -bound2, bound2)
    b2 = jax.random.uniform(k4, (OUTPUT_CLASSES,), jnp.float32, -bound2, bound2)
    return w1, b1, w2, b2


if __name__ == "__main__":
    key = jax.random.PRNGKey(0)
    k_x, k_p = jax.random.split(key)

    # The original script feeds rows of X_train (4 features each).
    B = 8
    x = jax.random.normal(k_x, (B, INPUT_FEATURES), jnp.float32)
    w1, b1, w2, b2 = init_params(k_p)

    out = net_forward(x, w1, b1, w2, b2)
    jax.block_until_ready(out)

    # Pure-JAX reference: y = sigmoid(x W1^T + b1) W2^T + b2 (same as PyTorch forward).
    y_ref = jax.nn.sigmoid(x @ w1.T + b1) @ w2.T + b2
    assert out.shape == (B, OUTPUT_CLASSES)
    assert jnp.allclose(out, y_ref, atol=1e-4, rtol=1e-4), float(jnp.max(jnp.abs(out - y_ref)))

    # Second check: exercises padding, sublane tiling, and a multi-step grid.
    B2 = 2000
    x2 = jax.random.normal(k_x, (B2, INPUT_FEATURES), jnp.float32)
    out2 = net_forward(x2, w1, b1, w2, b2, block_rows=8)
    jax.block_until_ready(out2)
    y2_ref = jax.nn.sigmoid(x2 @ w1.T + b1) @ w2.T + b2
    assert out2.shape == (B2, OUTPUT_CLASSES)
    assert jnp.allclose(out2, y2_ref, atol=1e-4, rtol=1e-4), float(jnp.max(jnp.abs(out2 - y2_ref)))

    print("KERNEL_OK")
</pallas_src>

<mosaic_0001>
module attributes {stable_mosaic.version = 11 : i64} {
  func.func @mlp_kernel(%arg0: i32, %arg1: memref<20xf32, #tpu.memory_space<smem>>, %arg2: memref<5xf32, #tpu.memory_space<smem>>, %arg3: memref<5xf32, #tpu.memory_space<smem>>, %arg4: memref<1xf32, #tpu.memory_space<smem>>, %arg5: memref<4x8x128xf32, #tpu.memory_space<vmem>>, %arg6: memref<1x8x128xf32, #tpu.memory_space<vmem>>) attributes {dimension_semantics = [#tpu.dimension_semantics<parallel>], iteration_bounds = array<i64: 1>, scalar_prefetch = 0 : i64, scratch_operands = 0 : i64, tpu.core_type = #tpu.core_type<tc>, window_params = [{transform_indices = @transform_0, window_bounds = array<i64: 20>}, {transform_indices = @transform_1, window_bounds = array<i64: 5>}, {transform_indices = @transform_2, window_bounds = array<i64: 5>}, {transform_indices = @transform_3, window_bounds = array<i64: 1>}, {transform_indices = @transform_4, window_bounds = array<i64: 4, 8, 128>}, {transform_indices = @transform_5, window_bounds = array<i64: 1, 8, 128>}]} {
    %c0 = arith.constant 0 : index
    %c0_0 = arith.constant 0 : index
    %c0_1 = arith.constant 0 : index
    %0 = vector.load %arg5[%c0, %c0_0, %c0_1] : memref<4x8x128xf32, #tpu.memory_space<vmem>>, vector<1x8x128xf32>
    %1 = vector.shape_cast %0 : vector<1x8x128xf32> to vector<8x128xf32>
    %c1 = arith.constant 1 : index
    %c0_2 = arith.constant 0 : index
    %c0_3 = arith.constant 0 : index
    %2 = vector.load %arg5[%c1, %c0_2, %c0_3] : memref<4x8x128xf32, #tpu.memory_space<vmem>>, vector<1x8x128xf32>
    %3 = vector.shape_cast %2 : vector<1x8x128xf32> to vector<8x128xf32>
    %c2 = arith.constant 2 : index
    %c0_4 = arith.constant 0 : index
    %c0_5 = arith.constant 0 : index
    %4 = vector.load %arg5[%c2, %c0_4, %c0_5] : memref<4x8x128xf32, #tpu.memory_space<vmem>>, vector<1x8x128xf32>
    %5 = vector.shape_cast %4 : vector<1x8x128xf32> to vector<8x128xf32>
    %c3 = arith.constant 3 : index
    %c0_6 = arith.constant 0 : index
    %c0_7 = arith.constant 0 : index
    %6 = vector.load %arg5[%c3, %c0_6, %c0_7] : memref<4x8x128xf32, #tpu.memory_space<vmem>>, vector<1x8x128xf32>
    %7 = vector.shape_cast %6 : vector<1x8x128xf32> to vector<8x128xf32>
    %c0_8 = arith.constant 0 : index
    %8 = memref.load %arg4[%c0_8] : memref<1xf32, #tpu.memory_space<smem>>
    %9 = vector.broadcast %8 : f32 to vector<8x128xf32>
    %c0_9 = arith.constant 0 : index
    %10 = memref.load %arg2[%c0_9] : memref<5xf32, #tpu.memory_space<smem>>
    %11 = vector.broadcast %10 : f32 to vector<8x128xf32>
    %c0_10 = arith.constant 0 : index
    %12 = memref.load %arg1[%c0_10] : memref<20xf32, #tpu.memory_space<smem>>
    %13 = vector.broadcast %12 : f32 to vector<8x128xf32>
    %14 = arith.mulf %13, %1 : vector<8x128xf32>
    %15 = arith.addf %11, %14 : vector<8x128xf32>
    %c1_11 = arith.constant 1 : index
    %16 = memref.load %arg1[%c1_11] : memref<20xf32, #tpu.memory_space<smem>>
    %17 = vector.broadcast %16 : f32 to vector<8x128xf32>
    %18 = arith.mulf %17, %3 : vector<8x128xf32>
    %19 = arith.addf %15, %18 : vector<8x128xf32>
    %c2_12 = arith.constant 2 : index
    %20 = memref.load %arg1[%c2_12] : memref<20xf32, #tpu.memory_space<smem>>
    %21 = vector.broadcast %20 : f32 to vector<8x128xf32>
    %22 = arith.mulf %21, %5 : vector<8x128xf32>
    %23 = arith.addf %19, %22 : vector<8x128xf32>
    %c3_13 = arith.constant 3 : index
    %24 = memref.load %arg1[%c3_13] : memref<20xf32, #tpu.memory_space<smem>>
    %25 = vector.broadcast %24 : f32 to vector<8x128xf32>
    %26 = arith.mulf %25, %7 : vector<8x128xf32>
    %27 = arith.addf %23, %26 : vector<8x128xf32>
    %cst = arith.constant 5.000000e-01 : f32
    %28 = vector.broadcast %cst : f32 to vector<8x128xf32>
    %29 = arith.mulf %28, %27 : vector<8x128xf32>
    %30 = math.tanh %29 : vector<8x128xf32>
    %cst_14 = arith.constant 5.000000e-01 : f32
    %31 = vector.broadcast %cst_14 : f32 to vector<8x128xf32>
    %32 = arith.mulf %31, %30 : vector<8x128xf32>
    %cst_15 = arith.constant 5.000000e-01 : f32
    %33 = vector.broadcast %cst_15 : f32 to vector<8x128xf32>
    %34 = arith.addf %32, %33 : vector<8x128xf32>
    %c0_16 = arith.constant 0 : index
    %35 = memref.load %arg3[%c0_16] : memref<5xf32, #tpu.memory_space<smem>>
    %36 = vector.broadcast %35 : f32 to vector<8x128xf32>
    %37 = arith.mulf %36, %34 : vector<8x128xf32>
    %38 = arith.addf %9, %37 : vector<8x128xf32>
    %c1_17 = arith.constant 1 : index
    %39 = memref.load %arg2[%c1_17] : memref<5xf32, #tpu.memory_space<smem>>
    %40 = vector.broadcast %39 : f32 to vector<8x128xf32>
    %c4 = arith.constant 4 : index
    %41 = memref.load %arg1[%c4] : memref<20xf32, #tpu.memory_space<smem>>
    %42 = vector.broadcast %41 : f32 to vector<8x128xf32>
    %43 = arith.mulf %42, %1 : vector<8x128xf32>
    %44 = arith.addf %40, %43 : vector<8x128xf32>
    %c5 = arith.constant 5 : index
    %45 = memref.load %arg1[%c5] : memref<20xf32, #tpu.memory_space<smem>>
    %46 = vector.broadcast %45 : f32 to vector<8x128xf32>
    %47 = arith.mulf %46, %3 : vector<8x128xf32>
    %48 = arith.addf %44, %47 : vector<8x128xf32>
    %c6 = arith.constant 6 : index
    %49 = memref.load %arg1[%c6] : memref<20xf32, #tpu.memory_space<smem>>
    %50 = vector.broadcast %49 : f32 to vector<8x128xf32>
    %51 = arith.mulf %50, %5 : vector<8x128xf32>
    %52 = arith.addf %48, %51 : vector<8x128xf32>
    %c7 = arith.constant 7 : index
    %53 = memref.load %arg1[%c7] : memref<20xf32, #tpu.memory_space<smem>>
    %54 = vector.broadcast %53 : f32 to vector<8x128xf32>
    %55 = arith.mulf %54, %7 : vector<8x128xf32>
    %56 = arith.addf %52, %55 : vector<8x128xf32>
    %cst_18 = arith.constant 5.000000e-01 : f32
    %57 = vector.broadcast %cst_18 : f32 to vector<8x128xf32>
    %58 = arith.mulf %57, %56 : vector<8x128xf32>
    %59 = math.tanh %58 : vector<8x128xf32>
    %cst_19 = arith.constant 5.000000e-01 : f32
    %60 = vector.broadcast %cst_19 : f32 to vector<8x128xf32>
    %61 = arith.mulf %60, %59 : vector<8x128xf32>
    %cst_20 = arith.constant 5.000000e-01 : f32
    %62 = vector.broadcast %cst_20 : f32 to vector<8x128xf32>
    %63 = arith.addf %61, %62 : vector<8x128xf32>
    %c1_21 = arith.constant 1 : index
    %64 = memref.load %arg3[%c1_21] : memref<5xf32, #tpu.memory_space<smem>>
    %65 = vector.broadcast %64 : f32 to vector<8x128xf32>
    %66 = arith.mulf %65, %63 : vector<8x128xf32>
    %67 = arith.addf %38, %66 : vector<8x128xf32>
    %c2_22 = arith.constant 2 : index
    %68 = memref.load %arg2[%c2_22] : memref<5xf32, #tpu.memory_space<smem>>
    %69 = vector.broadcast %68 : f32 to vector<8x128xf32>
    %c8 = arith.constant 8 : index
    %70 = memref.load %arg1[%c8] : memref<20xf32, #tpu.memory_space<smem>>
    %71 = vector.broadcast %70 : f32 to vector<8x128xf32>
    %72 = arith.mulf %71, %1 : vector<8x128xf32>
    %73 = arith.addf %69, %72 : vector<8x128xf32>
    %c9 = arith.constant 9 : index
    %74 = memref.load %arg1[%c9] : memref<20xf32, #tpu.memory_space<smem>>
    %75 = vector.broadcast %74 : f32 to vector<8x128xf32>
    %76 = arith.mulf %75, %3 : vector<8x128xf32>
    %77 = arith.addf %73, %76 : vector<8x128xf32>
    %c10 = arith.constant 10 : index
    %78 = memref.load %arg1[%c10] : memref<20xf32, #tpu.memory_space<smem>>
    %79 = vector.broadcast %78 : f32 to vector<8x128xf32>
    %80 = arith.mulf %79, %5 : vector<8x128xf32>
    %81 = arith.addf %77, %80 : vector<8x128xf32>
    %c11 = arith.constant 11 : index
    %82 = memref.load %arg1[%c11] : memref<20xf32, #tpu.memory_space<smem>>
    %83 = vector.broadcast %82 : f32 to vector<8x128xf32>
    %84 = arith.mulf %83, %7 : vector<8x128xf32>
    %85 = arith.addf %81, %84 : vector<8x128xf32>
    %cst_23 = arith.constant 5.000000e-01 : f32
    %86 = vector.broadcast %cst_23 : f32 to vector<8x128xf32>
    %87 = arith.mulf %86, %85 : vector<8x128xf32>
    %88 = math.tanh %87 : vector<8x128xf32>
    %cst_24 = arith.constant 5.000000e-01 : f32
    %89 = vector.broadcast %cst_24 : f32 to vector<8x128xf32>
    %90 = arith.mulf %89, %88 : vector<8x128xf32>
    %cst_25 = arith.constant 5.000000e-01 : f32
    %91 = vector.broadcast %cst_25 : f32 to vector<8x128xf32>
    %92 = arith.addf %90, %91 : vector<8x128xf32>
    %c2_26 = arith.constant 2 : index
    %93 = memref.load %arg3[%c2_26] : memref<5xf32, #tpu.memory_space<smem>>
    %94 = vector.broadcast %93 : f32 to vector<8x128xf32>
    %95 = arith.mulf %94, %92 : vector<8x128xf32>
    %96 = arith.addf %67, %95 : vector<8x128xf32>
    %c3_27 = arith.constant 3 : index
    %97 = memref.load %arg2[%c3_27] : memref<5xf32, #tpu.memory_space<smem>>
    %98 = vector.broadcast %97 : f32 to vector<8x128xf32>
    %c12 = arith.constant 12 : index
    %99 = memref.load %arg1[%c12] : memref<20xf32, #tpu.memory_space<smem>>
    %100 = vector.broadcast %99 : f32 to vector<8x128xf32>
    %101 = arith.mulf %100, %1 : vector<8x128xf32>
    %102 = arith.addf %98, %101 : vector<8x128xf32>
    %c13 = arith.constant 13 : index
    %103 = memref.load %arg1[%c13] : memref<20xf32, #tpu.memory_space<smem>>
    %104 = vector.broadcast %103 : f32 to vector<8x128xf32>
    %105 = arith.mulf %104, %3 : vector<8x128xf32>
    %106 = arith.addf %102, %105 : vector<8x128xf32>
    %c14 = arith.constant 14 : index
    %107 = memref.load %arg1[%c14] : memref<20xf32, #tpu.memory_space<smem>>
    %108 = vector.broadcast %107 : f32 to vector<8x128xf32>
    %109 = arith.mulf %108, %5 : vector<8x128xf32>
    %110 = arith.addf %106, %109 : vector<8x128xf32>
    %c15 = arith.constant 15 : index
    %111 = memref.load %arg1[%c15] : memref<20xf32, #tpu.memory_space<smem>>
    %112 = vector.broadcast %111 : f32 to vector<8x128xf32>
    %113 = arith.mulf %112, %7 : vector<8x128xf32>
    %114 = arith.addf %110, %113 : vector<8x128xf32>
    %cst_28 = arith.constant 5.000000e-01 : f32
    %115 = vector.broadcast %cst_28 : f32 to vector<8x128xf32>
    %116 = arith.mulf %115, %114 : vector<8x128xf32>
    %117 = math.tanh %116 : vector<8x128xf32>
    %cst_29 = arith.constant 5.000000e-01 : f32
    %118 = vector.broadcast %cst_29 : f32 to vector<8x128xf32>
    %119 = arith.mulf %118, %117 : vector<8x128xf32>
    %cst_30 = arith.constant 5.000000e-01 : f32
    %120 = vector.broadcast %cst_30 : f32 to vector<8x128xf32>
    %121 = arith.addf %119, %120 : vector<8x128xf32>
    %c3_31 = arith.constant 3 : index
    %122 = memref.load %arg3[%c3_31] : memref<5xf32, #tpu.memory_space<smem>>
    %123 = vector.broadcast %122 : f32 to vector<8x128xf32>
    %124 = arith.mulf %123, %121 : vector<8x128xf32>
    %125 = arith.addf %96, %124 : vector<8x128xf32>
    %c4_32 = arith.constant 4 : index
    %126 = memref.load %arg2[%c4_32] : memref<5xf32, #tpu.memory_space<smem>>
    %127 = vector.broadcast %126 : f32 to vector<8x128xf32>
    %c16 = arith.constant 16 : index
    %128 = memref.load %arg1[%c16] : memref<20xf32, #tpu.memory_space<smem>>
    %129 = vector.broadcast %128 : f32 to vector<8x128xf32>
    %130 = arith.mulf %129, %1 : vector<8x128xf32>
    %131 = arith.addf %127, %130 : vector<8x128xf32>
    %c17 = arith.constant 17 : index
    %132 = memref.load %arg1[%c17] : memref<20xf32, #tpu.memory_space<smem>>
    %133 = vector.broadcast %132 : f32 to vector<8x128xf32>
    %134 = arith.mulf %133, %3 : vector<8x128xf32>
    %135 = arith.addf %131, %134 : vector<8x128xf32>
    %c18 = arith.constant 18 : index
    %136 = memref.load %arg1[%c18] : memref<20xf32, #tpu.memory_space<smem>>
    %137 = vector.broadcast %136 : f32 to vector<8x128xf32>
    %138 = arith.mulf %137, %5 : vector<8x128xf32>
    %139 = arith.addf %135, %138 : vector<8x128xf32>
    %c19 = arith.constant 19 : index
    %140 = memref.load %arg1[%c19] : memref<20xf32, #tpu.memory_space<smem>>
    %141 = vector.broadcast %140 : f32 to vector<8x128xf32>
    %142 = arith.mulf %141, %7 : vector<8x128xf32>
    %143 = arith.addf %139, %142 : vector<8x128xf32>
    %cst_33 = arith.constant 5.000000e-01 : f32
    %144 = vector.broadcast %cst_33 : f32 to vector<8x128xf32>
    %145 = arith.mulf %144, %143 : vector<8x128xf32>
    %146 = math.tanh %145 : vector<8x128xf32>
    %cst_34 = arith.constant 5.000000e-01 : f32
    %147 = vector.broadcast %cst_34 : f32 to vector<8x128xf32>
    %148 = arith.mulf %147, %146 : vector<8x128xf32>
    %cst_35 = arith.constant 5.000000e-01 : f32
    %149 = vector.broadcast %cst_35 : f32 to vector<8x128xf32>
    %150 = arith.addf %148, %149 : vector<8x128xf32>
    %c4_36 = arith.constant 4 : index
    %151 = memref.load %arg3[%c4_36] : memref<5xf32, #tpu.memory_space<smem>>
    %152 = vector.broadcast %151 : f32 to vector<8x128xf32>
    %153 = arith.mulf %152, %150 : vector<8x128xf32>
    %154 = arith.addf %125, %153 : vector<8x128xf32>
    %c0_37 = arith.constant 0 : index
    %c0_38 = arith.constant 0 : index
    %c0_39 = arith.constant 0 : index
    %155 = vector.load %arg6[%c0_37, %c0_38, %c0_39] : memref<1x8x128xf32, #tpu.memory_space<vmem>>, vector<1x8x128xf32>
    %156 = vector.shape_cast %155 : vector<1x8x128xf32> to vector<8x128xf32>
    %157 = vector.shape_cast %154 : vector<8x128xf32> to vector<1x8x128xf32>
    tpu.vector_store %arg6[%c0_37, %c0_38, %c0_39], %157 {strides = array<i32>} : memref<1x8x128xf32, #tpu.memory_space<vmem>>, vector<1x8x128xf32>,
    return
  }
  func.func @transform_0(%arg0: i32) -> i32 {
    %c0_i32 = arith.constant 0 : i32
    %c0_i32_0 = arith.constant 0 : i32
    return %c0_i32 : i32
  }
  func.func @transform_1(%arg0: i32) -> i32 {
    %c0_i32 = arith.constant 0 : i32
    %c0_i32_0 = arith.constant 0 : i32
    return %c0_i32 : i32
  }
  func.func @transform_2(%arg0: i32) -> i32 {
    %c0_i32 = arith.constant 0 : i32
    %c0_i32_0 = arith.constant 0 : i32
    return %c0_i32 : i32
  }
  func.func @transform_3(%arg0: i32) -> i32 {
    %c0_i32 = arith.constant 0 : i32
    %c0_i32_0 = arith.constant 0 : i32
    return %c0_i32 : i32
  }
  func.func @transform_4(%arg0: i32) -> (i32, i32, i32) {
    %c0_i32 = arith.constant 0 : i32
    %c0_i32_0 = arith.constant 0 : i32
    %c0_i32_1 = arith.constant 0 : i32
    return %c0_i32, %arg0, %c0_i32_0 : i32, i32, i32
  }
  func.func @transform_5(%arg0: i32) -> (i32, i32, i32) {
    %c0_i32 = arith.constant 0 : i32
    %c0_i32_0 = arith.constant 0 : i32
    %c0_i32_1 = arith.constant 0 : i32
    return %c0_i32, %arg0, %c0_i32_0 : i32, i32, i32
  }
}

</mosaic_0001>

<bundles_post_ra>
// kernel: net_forward_features_first.1
= control target key start
LH: loop header
LB: loop body
LE: loop exit
PB: predicated region body
PF: predicated region fallthrough
CT: control target
= control target key end

     0   :  { %11 = vsyncpa [#allocation4], 0  ;;  %s431_s0 = inlined_call_operand.vmem [shape: f32[20], index: 0, kind: input, shape index: {}]   ;;  %s432_s1 = inlined_call_operand.vmem [shape: f32[5], index: 1, kind: input, shape index: {}]   ;;  %s433_s2 = inlined_call_operand.vmem [shape: f32[5], index: 2, kind: input, shape index: {}]   ;;  %s434_s3 = inlined_call_operand.<no memory space> [shape: f32[1], index: 3, kind: input, shape index: {}]   ;;  %s435_s4 = inlined_call_operand.vmem [shape: f32[4,8,128], index: 4, kind: input, shape index: {}]   ;;  %s436_s5 = inlined_call_operand.vmem [shape: f32[1,8,128], index: 5, kind: output, shape index: {}]  }
   0x1   :  { %12 = vsyncpa [#allocation6], 0  ;;  %s29_s20 = sshll.u32 %s432_s1, 4  ;;  %s19_s23 = sshll.u32 %s431_s0, 4  ;;  %s30_s20 = int_to_ptr.vmem [resolvable:$true] %s29_s20  ;;  %s20_s23 = int_to_ptr.vmem [resolvable:$true] %s19_s23 }
   0x2   :  { %s246_s24 = scalar_lea.vmem %s30_s20, 16  ;;  %p251_p1 = scmp.lt.s32.totalorder %s30_s20, %s30_s20 }
   0x3   :  { %p247_p0 = scmp.ne.s32.totalorder %s30_s20, %s246_s24  ;;  %p252_p2 = scmp.lt.s32.totalorder %s246_s24, %s246_s24 }
   0x5   :  { %p253_p3 = por %p252_p2, %p251_p1 }
   0x7   :  { %p254_p4 = pnand %p253_p3, %p247_p0 }
   0x9   :  { %257 = shalt.err (!%p254_p4)
}
   0xa   :  { %s286_s25 = smov [#allocation5]   ;;  %s258_s26 = scalar_lea.vmem %s20_s23, 16 }
   0xb   :  { %32 = dma.vmem_to_smem %s30_s20, 16, %s286_s25, [#allocation6]  }
   0xc   :  { %p259_p5 = scmp.ne.s32.totalorder %s20_s23, %s258_s26  ;;  %p263_p6 = scmp.lt.s32.totalorder %s20_s23, %s20_s23 }
   0xd   :  { %p264_p7 = scmp.lt.s32.totalorder %s258_s26, %s258_s26 }
   0xf   :  { %p265_p8 = por %p264_p7, %p263_p6 }
  0x11   :  { %p266_p9 = pnand %p265_p8, %p259_p5 }
  0x13   :  { %269 = shalt.err (!%p266_p9)
}
  0x14   :  { %s287_s1 = smov [#allocation3]   ;;  %s39_s28 = sshll.u32 %s433_s2, 4  ;;  %s40_s28 = int_to_ptr.vmem [resolvable:$true] %s39_s28 }
  0x15   :  { %22 = dma.vmem_to_smem %s20_s23, 16, %s287_s1, [#allocation4]  }
  0x16   :  { %s270_s29 = scalar_lea.vmem %s40_s28, 16  ;;  %p275_p11 = scmp.lt.s32.totalorder %s40_s28, %s40_s28 }
  0x17   :  { %p271_p10 = scmp.ne.s32.totalorder %s40_s28, %s270_s29  ;;  %p276_p12 = scmp.lt.s32.totalorder %s270_s29, %s270_s29 }
  0x19   :  { %p277_p13 = por %p276_p12, %p275_p11 }
  0x1b   :  { %p278_p0 = pnand %p277_p13, %p271_p10 }
  0x1d   :  { %281 = shalt.err (!%p278_p0)
}
  0x1e   :  { %s288_s30 = smov [#allocation7]  }
  0x1f   :  { %42 = dma.vmem_to_smem %s40_s28, 16, %s288_s30, [#allocation6]  }
  0x20   :  { %282 = dma.done.wait [#allocation4], 16  }
  0x21   :  { %283 = vsyncadd [#allocation4], 4294967280 }
  0x22   :  { %284 = dma.done.wait [#allocation6], 32  }
  0x23   :  { %285 = vsyncadd [#allocation6], 4294967264 }
  0x24   :  { %56 = sfence }
  0x25   :  { %s66_s6 = sld [smem:[#allocation5]]  ;;  %s206_s8 = sld [smem:[#allocation3 + $0x1]]  ;;  %v335_v0 = vld [vmem:[%s435_s4] sm:$0xff]  ;;  %v340_v1 = vld [vmem:[%s435_s4 + $0x8] sm:$0xff]  ;;  %v349_v2 = vld [vmem:[%s435_s4 + $0x10] sm:$0xff] }
  0x26   :  { %s68_s7 = sld [smem:[#allocation3]]  ;;  %s207_s9 = sld [smem:[#allocation3 + $0x2]]  ;;  %v366_v9 = vld [vmem:[%s435_s4 + $0x18] sm:$0xff] }
  0x27   :  { %s328_s2 = sld [smem:[#allocation3 + $0x3]]  ;;  %s330_s10 = sld [smem:[#allocation5 + $0x1]] }
  0x28   :  { %s210_s11 = sld [smem:[#allocation3 + $0x4]]  ;;  %s211_s12 = sld [smem:[#allocation3 + $0x5]] }
  0x29   :  { %s342_s17 = sld [smem:[#allocation3 + $0x6]]  ;;  %s344_s18 = sld [smem:[#allocation3 + $0x7]] }
  0x2a   :  { %s351_s21 = sld [smem:[#allocation5 + $0x2]]  ;;  %s353_s22 = sld [smem:[#allocation3 + $0x8]] }
  0x2b   :  { %v67_v3 = vstv %s66_s6  ;;  %v73_v5 = vstv %s206_s8  ;;  %s355_s23 = sld [smem:[#allocation3 + $0x9]]  ;;  %s359_s24 = sld [smem:[#allocation3 + $0xa]] }
  0x2c   :  { %v69_v4 = vstv %s68_s7  ;;  %v74_v7 = vmul.f32 %v340_v1, %v73_v5  ;;  %v77_v8 = vstv %s207_s9  ;;  %s361_s25 = sld [smem:[#allocation3 + $0xb]]  ;;  %s373_s27 = sld [smem:[#allocation3 + $0xc]] }
  0x2d   :  { %v70_v6 = vmul.f32 %v69_v4, %v335_v0  ;;  %v78_v10 = vmul.f32 %v349_v2, %v77_v8  ;;  %v81_v11 = vstv %s328_s2  ;;  %s370_s0 = sld [smem:[#allocation5 + $0x3]]  ;;  %v93_v13 = vstv %s330_s10  ;;  %s375_s28 = sld [smem:[#allocation3 + $0xd]] }
  0x2e   :  { %v95_v14 = vstv %s210_s11  ;;  %v99_v15 = vstv %s211_s12  ;;  %s380_s4 = sld [smem:[#allocation3 + $0xe]]  ;;  %s382_s29 = sld [smem:[#allocation3 + $0xf]]  ;;  %v82_v20 = vmul.f32 %v366_v9, %v81_v11 }
  0x2f   :  { %v71_v12 = vadd.f32 %v70_v6, %v67_v3  ;;  %v96_v16 = vmul.f32 %v95_v14, %v335_v0  ;;  %v100_v17 = vmul.f32 %v340_v1, %v99_v15  ;;  %v103_v18 = vstv %s342_s17  ;;  %s387_s30 = sld [smem:[#allocation5 + $0x4]]  ;;  %s392_s6 = sld [smem:[#allocation3 + $0x10]] }
  0x30   :  { %v104_v21 = vmul.f32 %v349_v2, %v103_v18  ;;  %v107_v22 = vstv %s344_s18  ;;  %v119_v24 = vstv %s351_s21  ;;  %v121_v25 = vstv %s353_s22  ;;  %s394_s7 = sld [smem:[#allocation3 + $0x11]]  ;;  %s402_s8 = sld [smem:[#allocation3 + $0x12]] }
  0x31   :  { %v75_v19 = vadd.f32 %v74_v7, %v71_v12  ;;  %v97_v23 = vadd.f32 %v96_v16, %v93_v13  ;;  %v125_v26 = vstv %s355_s23  ;;  %v122_v28 = vmul.f32 %v121_v25, %v335_v0  ;;  %s404_s9 = sld [smem:[#allocation3 + $0x13]]  ;;  %s88_s2 = sld [smem:[#allocation7]] }
  0x32   :  { %v126_v29 = vmul.f32 %v340_v1, %v125_v26  ;;  %v129_v30 = vstv %s359_s24  ;;  %v108_v32 = vmul.f32 %v366_v9, %v107_v22  ;;  %v133_v34 = vstv %s361_s25  ;;  %s214_s10 = sld [smem:[#allocation7 + $0x1]]  ;;  %s220_s11 = sld [smem:[#allocation7 + $0x2]] }
  0x33   :  { %v79_v27 = vadd.f32 %v78_v10, %v75_v19  ;;  %v101_v31 = vadd.f32 %v100_v17, %v97_v23  ;;  %v130_v33 = vmul.f32 %v349_v2, %v129_v30  ;;  %v123_v36 = vadd.f32 %v122_v28, %v119_v24  ;;  %s226_s14 = sld [smem:[#allocation7 + $0x3]]  ;;  %s232_s15 = sld [smem:[#allocation7 + $0x4]] }
  0x34   :  { %v134_v37 = vmul.f32 %v366_v9, %v133_v34  ;;  %v145_v38 = vstv %s370_s0  ;;  %v147_v40 = vstv %s373_s27  ;;  %v151_v41 = vstv %s375_s28 }
  0x35   :  { %v83_v35 = vadd.f32 %v82_v20, %v79_v27  ;;  %v105_v39 = vadd.f32 %v104_v21, %v101_v31  ;;  %v155_v42 = vstv %s380_s4  ;;  %v127_v44 = vadd.f32 %v126_v29, %v123_v36 }
  0x36   :  { %v148_v45 = vmul.f32 %v147_v40, %v335_v0  ;;  %v152_v46 = vmul.f32 %v340_v1, %v151_v41  ;;  %v156_v48 = vmul.f32 %v349_v2, %v155_v42  ;;  %v159_v49 = vstv %s382_s29 }
  0x37   :  { %v84_v43 = vmul.f32 0.5, %v83_v35  ;;  %v109_v47 = vadd.f32 %v108_v32, %v105_v39  ;;  %v131_v50 = vadd.f32 %v130_v33, %v127_v44  ;;  %v160_v52 = vmul.f32 %v366_v9, %v159_v49 }
  0x38   :  { %v149_v51 = vadd.f32 %v148_v45, %v145_v38  ;;  %v171_v54 = vstv %s387_s30  ;;  %v173_v55 = vstv %s392_s6  ;;  %v177_v56 = vstv %s394_s7 }
  0x39   :  { %236 = vtanh.f32 %v84_v43  ;;  %v110_v53 = vmul.f32 0.5, %v109_v47  ;;  %v135_v57 = vadd.f32 %v134_v37, %v131_v50  ;;  %v174_v59 = vmul.f32 %v173_v55, %v335_v0 }
  0x3a   :  { %v153_v58 = vadd.f32 %v152_v46, %v149_v51  ;;  %v178_v60 = vmul.f32 %v340_v1, %v177_v56  ;;  %v181_v61 = vstv %s402_s8  ;;  %v185_v62 = vstv %s404_s9 }
  0x3b   :  { %238 = vtanh.f32 %v110_v53  ;;  %v136_v63 = vmul.f32 0.5, %v135_v57  ;;  %v175_v4 = vadd.f32 %v174_v59, %v171_v54  ;;  %v182_v5 = vmul.f32 %v349_v2, %v181_v61 }
  0x3c   :  { %v157_v3 = vadd.f32 %v156_v48, %v153_v58  ;;  %v186_v8 = vmul.f32 %v366_v9, %v185_v62  ;;  %v89_v13 = vstv %s88_s2  ;;  %v65_v2 = vstv %s434_s3 }
  0x3d   :  { %240 = vtanh.f32 %v136_v63  ;;  %v179_v7 = vadd.f32 %v178_v60, %v175_v4  ;;  %v115_v18 = vstv %s214_s10  ;;  %v141_v24 = vstv %s220_s11 }
  0x3e   :  { %v161_v6 = vadd.f32 %v160_v52, %v157_v3  ;;  %v167_v30 = vstv %s226_s14  ;;  %v193_v36 = vstv %s232_s15 }
  0x3f   :  { %v183_v11 = vadd.f32 %v182_v5, %v179_v7 }
  0x40   :  { %v162_v10 = vmul.f32 0.5, %v161_v6 }
  0x41   :  { %v187_v1 = vadd.f32 %v186_v8, %v183_v11 }
  0x42   :  { %242 = vtanh.f32 %v162_v10 }
  0x43   :  { %v237_v0 = vpop.eup %236  ;;  %v188_v14 = vmul.f32 0.5, %v187_v1 }
  0x44   :  { %v86_v12 = vmul.f32 0.5, %v237_v0 }
  0x45   :  { %v239_v15 = vpop.eup %238  ;;  %244 = vtanh.f32 %v188_v14 }
  0x46   :  { %v87_v16 = vadd.f32 0.5, %v86_v12  ;;  %v112_v17 = vmul.f32 0.5, %v239_v15 }
  0x47   :  { %v241_v19 = vpop.eup %240 }
  0x48   :  { %v90_v9 = vmul.f32 %v89_v13, %v87_v16  ;;  %v113_v20 = vadd.f32 0.5, %v112_v17  ;;  %v138_v22 = vmul.f32 0.5, %v241_v19 }
  0x4a   :  { %v91_v21 = vadd.f32 %v90_v9, %v65_v2  ;;  %v116_v23 = vmul.f32 %v115_v18, %v113_v20  ;;  %v139_v25 = vadd.f32 0.5, %v138_v22 }
  0x4c   :  { %v243_v26 = vpop.eup %242  ;;  %v117_v27 = vadd.f32 %v116_v23, %v91_v21  ;;  %v142_v28 = vmul.f32 %v141_v24, %v139_v25 }
  0x4d   :  { %v164_v29 = vmul.f32 0.5, %v243_v26 }
  0x4e   :  { %v143_v31 = vadd.f32 %v142_v28, %v117_v27 }
  0x4f   :  { %v165_v32 = vadd.f32 0.5, %v164_v29  ;;  %v245_v33 = vpop.eup %244 }
  0x50   :  { %v190_v35 = vmul.f32 0.5, %v245_v33 }
  0x51   :  { %v168_v34 = vmul.f32 %v167_v30, %v165_v32 }
  0x52   :  { %v191_v38 = vadd.f32 0.5, %v190_v35 }
  0x53   :  { %v169_v37 = vadd.f32 %v168_v34, %v143_v31 }
  0x54   :  { %v194_v39 = vmul.f32 %v193_v36, %v191_v38 }
  0x56   :  { %v195_v40 = vadd.f32 %v194_v39, %v169_v37 }
  0x58   :  { %196 = vst [vmem:[%s436_s5] sm:$0xff] %v195_v40 }
  0x59   :  { %201 = vsyncpa [#allocation4], 1 }
  0x5a   :  { %202 = vsyncpa [#allocation6], 1 }

</bundles_post_ra>
